<compile_context>
chip_gen: v6e
topology: v6e:2x2x1
jax: 0.10.0
libtpu: 0.0.40
codegen_flags: <defaults>
</compile_context>

<pallas_src>
import functools
import math

import jax
import jax.numpy as jnp
from jax.experimental import pallas as pl
from jax.experimental.pallas import tpu as pltpu


def _round_up(x, m):
    return (x + m - 1) // m * m


def _choose_tk(Kp, cap=2048):
    """Largest multiple-of-128 divisor of Kp that is <= cap (Kp % 128 == 0)."""
    if Kp <= cap:
        return Kp
    for t in range(cap, 127, -128):
        if Kp % t == 0:
            return t
    return 128


def _choose_tn(Np):
    """Lane-dense N tile: 256 when it divides, else the full (<=512) width, else 128."""
    if Np % 256 == 0:
        return 256
    if Np <= 512:
        return Np
    return 128


def _choose_tm(M, cap=256, floor=128):
    """Largest M tile (<=cap) that does not waste much padding; never below 8."""
    tm = min(cap, _round_up(M, 8))
    if tm <= floor:
        return tm
    best, best_pad = tm, _round_up(M, tm) - M
    t = tm
    while t > floor:
        t //= 2
        pad = _round_up(M, t) - M
        if pad < best_pad:
            best, best_pad = t, pad
    return best


# --------------------------------------------------------------------------
# Fused matmul + per-channel-scale + bias + activation kernel.
# Operands: bf16 LHS, bf16 or int8 RHS (int8 is cast to bf16 in VMEM), f32
# accumulation in a VMEM scratch across k, bf16 (or f32) output written only
# on the last k step.
# --------------------------------------------------------------------------
def _mm_kernel(a_ref, b_ref, bias_ref, qs_ref, o_ref, acc_ref, *, act, scale):
    @pl.when(pl.program_id(2) == 0)
    def _():
        acc_ref[...] = jnp.zeros_like(acc_ref)

    acc_ref[...] += jnp.dot(a_ref[...], b_ref[...].astype(jnp.bfloat16),
                            preferred_element_type=jnp.float32)

    @pl.when(pl.program_id(2) == pl.num_programs(2) - 1)
    def _():
        r = acc_ref[...] * qs_ref[...] + bias_ref[...]
        if act == "relu":
            r = jnp.maximum(r, 0.0)
        elif act == "tanh":
            r = jnp.tanh(scale * r)
        o_ref[...] = r.astype(o_ref.dtype)


def _prepare_weight(w, b, quantize=False):
    """w: (K, N) f32, b: (N,) f32 -> (padded weight, padded bias row, per-col scale row).

    quantize=True  -> int8 weight with per-output-channel scales (dequant in epilogue)
    quantize=False -> bf16 weight, scale row of ones.
    """
    K, N = w.shape
    Kp = _round_up(K, 128)
    Np = _round_up(N, 128)
    w_p = jnp.pad(w, ((0, Kp - K), (0, Np - N)))
    b_p = jnp.pad(b, ((0, Np - N),)).reshape(1, Np).astype(jnp.float32)
    if quantize:
        amax = jnp.max(jnp.abs(w_p), axis=0)
        qs = jnp.where(amax > 0, amax / 127.0, 1.0).astype(jnp.float32)
        w_q = jnp.clip(jnp.round(w_p / qs[None, :]), -127.0, 127.0).astype(jnp.int8)
        return w_q, b_p, qs.reshape(1, Np)
    return w_p.astype(jnp.bfloat16), b_p, jnp.ones((1, Np), jnp.float32)


def matmul_bias_act(a, w_p, b_p, qs_p, n_out, act="none", scale=1.0,
                    out_dtype=jnp.bfloat16):
    """out = act((a @ W) * qs + b).  a: (M, K); w_p: (Kp, Np) bf16/int8 pre-padded."""
    M, K = a.shape
    Kp, Np = w_p.shape
    if a.dtype != jnp.bfloat16:
        a = a.astype(jnp.bfloat16)

    if M <= 8:
        # Batch-2 FC path: pure HBM weight streaming.  Single K step, 512-wide
        # weight tiles (<= ~4.7 MiB int8 / 9.2 MiB bf16 per buffer -> fits v7x).
        tm = 8
        tk = Kp
        tn = 512 if Np % 512 == 0 else _choose_tn(Np)
    else:
        tm = _choose_tm(M)
        tn = _choose_tn(Np)
        tk = Kp if Kp <= 4096 else _choose_tk(Kp)
    Mp = _round_up(M, tm)

    if Mp != M or Kp != K:
        a = jnp.pad(a, ((0, Mp - M), (0, Kp - K)))

    kernel = functools.partial(_mm_kernel, act=act, scale=scale)
    out = pl.pallas_call(
        kernel,
        out_shape=jax.ShapeDtypeStruct((Mp, Np), out_dtype),
        grid_spec=pltpu.PrefetchScalarGridSpec(
            num_scalar_prefetch=0,
            grid=(Mp // tm, Np // tn, Kp // tk),
            in_specs=[
                pl.BlockSpec((tm, tk), lambda i, j, k: (i, k)),
                pl.BlockSpec((tk, tn), lambda i, j, k: (k, j)),
                pl.BlockSpec((1, tn), lambda i, j, k: (0, j)),
                pl.BlockSpec((1, tn), lambda i, j, k: (0, j)),
            ],
            out_specs=pl.BlockSpec((tm, tn), lambda i, j, k: (i, j)),
            scratch_shapes=[pltpu.VMEM((tm, tn), jnp.float32)],
        ),
        compiler_params=pltpu.CompilerParams(
            dimension_semantics=("parallel", "parallel", "arbitrary"),
            vmem_limit_bytes=40 * 1024 * 1024),
    )(a, w_p, b_p, qs_p)
    if Mp != M or Np != n_out:
        out = out[:M, :n_out]
    return out


# --------------------------------------------------------------------------
# MaxPool2d(kernel_size=3, stride=2), NHWC.  W-direction 3-way max is three
# strided jnp.maximum calls (glue); the H-direction 3-way max runs in a
# lane-dense Pallas kernel (3x traffic instead of the old 9x stack).
# --------------------------------------------------------------------------
def _max3_kernel(x_ref, o_ref):
    o_ref[...] = jnp.max(x_ref[...], axis=0, keepdims=True)


def maxpool3x3s2_nhwc(x):
    """x: (N, H, W, C) -> (N, OH, OW, C), kernel 3, stride 2, no padding."""
    N, H, W, C = x.shape
    oh = (H - 3) // 2 + 1
    ow = (W - 3) // 2 + 1
    lim_w = 2 * (ow - 1) + 1
    xw = jnp.maximum(
        jnp.maximum(x[:, :, 0:lim_w:2, :], x[:, :, 1:1 + lim_w:2, :]),
        x[:, :, 2:2 + lim_w:2, :])                      # (N, H, ow, C)
    lim_h = 2 * (oh - 1) + 1
    rows = [xw[:, d:d + lim_h:2, :, :].reshape(-1) for d in range(3)]
    stacked = jnp.stack(rows, axis=0)                   # (3, N*oh*ow*C)
    M = stacked.shape[1]
    tile = min(1 << 17, _round_up(M, 128))
    Mp = _round_up(M, tile)
    if Mp != M:
        stacked = jnp.pad(stacked, ((0, 0), (0, Mp - M)))
    out = pl.pallas_call(
        _max3_kernel,
        out_shape=jax.ShapeDtypeStruct((1, Mp), x.dtype),
        grid=(Mp // tile,),
        in_specs=[pl.BlockSpec((3, tile), lambda i: (0, i))],
        out_specs=pl.BlockSpec((1, tile), lambda i: (0, i)),
        compiler_params=pltpu.CompilerParams(
            dimension_semantics=("parallel",)),
    )(stacked)
    return out[0, :M].reshape(N, oh, ow, C)


# --------------------------------------------------------------------------
# Conv2d via NHWC im2col (bf16 glue) + Pallas fused matmul/bias/ReLU
# --------------------------------------------------------------------------
def _im2col_nhwc(x, kh, kw, stride, pad):
    """(N, H, W, C) -> (N*OH*OW, kh*kw*C), feature order (kh, kw, C)."""
    N, H, W, C = x.shape
    xp = x
    if pad:
        xp = jnp.pad(x, ((0, 0), (pad, pad), (pad, pad), (0, 0)))
    Hp, Wp = H + 2 * pad, W + 2 * pad
    oh = (Hp - kh) // stride + 1
    ow = (Wp - kw) // stride + 1
    cols = []
    for i in range(kh):
        for j in range(kw):
            cols.append(xp[:, i:i + stride * (oh - 1) + 1:stride,
                              j:j + stride * (ow - 1) + 1:stride, :])
    p = jnp.stack(cols, axis=3)                     # (N, oh, ow, kh*kw, C)
    p = p.reshape(N * oh * ow, kh * kw * C)         # contiguous, no transpose
    return p, oh, ow


def conv2d_relu_nhwc(x, w_p, b_p, qs_p, oc, kh, kw, stride, pad):
    """x: NHWC bf16; w_p: pre-padded bf16 (kh*kw*C, OC) weight; fused bias + ReLU."""
    N = x.shape[0]
    patches, oh, ow = _im2col_nhwc(x, kh, kw, stride, pad)
    out = matmul_bias_act(patches, w_p, b_p, qs_p, oc, act="relu")
    return out.reshape(N, oh, ow, oc)               # stays NHWC, bf16


# --------------------------------------------------------------------------
# AlexNetFc model (deterministic synthetic init, eval-mode forward)
# --------------------------------------------------------------------------
class AlexNetFcPallas:
    # (out_ch, in_ch, kh, kw, stride, pad) for torchvision alexnet features
    _CONV_SPECS = [
        (64, 3, 11, 11, 4, 2),
        (192, 64, 5, 5, 1, 2),
        (384, 192, 3, 3, 1, 1),
        (256, 384, 3, 3, 1, 1),
        (256, 256, 3, 3, 1, 1),
    ]

    def __init__(self, hash_bit=48, key=None, quantize_fc=True):
        if key is None:
            key = jax.random.PRNGKey(0)
        self.hash_bit = hash_bit
        keys = jax.random.split(key, 8)
        std = 0.01

        # Conv weights: generated in PyTorch (OC, C, kh, kw) order, then
        # pre-transposed to (kh*kw*C, OC), padded and cast to bf16 ONCE.
        self.conv_params = []
        for k, (oc, ic, kh, kw, stride, pad) in zip(keys[:5], self._CONV_SPECS):
            w = std * jax.random.normal(k, (oc, ic, kh, kw), jnp.float32)
            b = jnp.zeros((oc,), jnp.float32)
            wt = w.transpose(2, 3, 1, 0).reshape(kh * kw * ic, oc)
            w_p, b_p, qs_p = _prepare_weight(wt, b, quantize=False)
            self.conv_params.append((w_p, b_p, qs_p, oc, kh, kw, stride, pad))

        # FC / hash weights: int8 per-output-channel quantized ONCE (halves the
        # dominant HBM weight stream; dequant scale applied in the epilogue).
        self.fc6_w, self.fc6_b, self.fc6_qs = _prepare_weight(
            std * jax.random.normal(keys[5], (256 * 6 * 6, 4096), jnp.float32),
            jnp.zeros((4096,), jnp.float32), quantize=quantize_fc)
        self.fc7_w, self.fc7_b, self.fc7_qs = _prepare_weight(
            std * jax.random.normal(keys[6], (4096, 4096), jnp.float32),
            jnp.zeros((4096,), jnp.float32), quantize=quantize_fc)
        # hash_layer: weight ~ N(0, 0.01), bias = 0 (matches module __init__)
        self.hash_w, self.hash_b, self.hash_qs = _prepare_weight(
            std * jax.random.normal(keys[7], (4096, hash_bit), jnp.float32),
            jnp.zeros((hash_bit,), jnp.float32), quantize=quantize_fc)

        # tanh-scale schedule constants from the module
        self.iter_num = 0
        self.gamma = 0.005
        self.power = 0.5
        self.init_scale = 1.0

    def forward(self, x):
        # Public API is NCHW f32 (PyTorch convention); go NHWC bf16 once.
        x = jnp.transpose(x, (0, 2, 3, 1)).astype(jnp.bfloat16)
        # ---- features ----
        x = conv2d_relu_nhwc(x, *self.conv_params[0])
        x = maxpool3x3s2_nhwc(x)
        x = conv2d_relu_nhwc(x, *self.conv_params[1])
        x = maxpool3x3s2_nhwc(x)
        x = conv2d_relu_nhwc(x, *self.conv_params[2])
        x = conv2d_relu_nhwc(x, *self.conv_params[3])
        x = conv2d_relu_nhwc(x, *self.conv_params[4])
        x = maxpool3x3s2_nhwc(x)
        # ---- flatten exactly like x.view(N, 256*6*6) on NCHW (tiny permute) ----
        x = jnp.transpose(x, (0, 3, 1, 2)).reshape(x.shape[0], 256 * 6 * 6)
        # ---- classifier[0:6]: Dropout(identity in eval), Linear+ReLU, Dropout, Linear+ReLU
        # TODO(synk): Dropout is identity at inference; training-mode RNG masking not implemented.
        x = matmul_bias_act(x, self.fc6_w, self.fc6_b, self.fc6_qs, 4096, act="relu")
        x = matmul_bias_act(x, self.fc7_w, self.fc7_b, self.fc7_qs, 4096, act="relu")
        # ---- hash layer + scaled tanh (iter_num == 0 -> scale == 1.0) ----
        scale = self.init_scale * math.pow(1.0 + self.gamma * self.iter_num, self.power)
        y = matmul_bias_act(x, self.hash_w, self.hash_b, self.hash_qs,
                            self.hash_bit, act="tanh", scale=scale,
                            out_dtype=jnp.float32)
        return y

    def output_num(self):
        return self.hash_bit


if __name__ == "__main__":
    key = jax.random.PRNGKey(0)
    k_x, k_p = jax.random.split(key)
    model = AlexNetFcPallas(hash_bit=48, key=k_p)
    # forward hard-codes the 256*6*6 flatten -> spatial input must be 224x224;
    # keep the batch small.
    x = jax.random.normal(k_x, (2, 3, 224, 224), jnp.float32)
    y = model.forward(x)
    y = jax.block_until_ready(y)
    assert y.shape == (2, 48), y.shape
    assert bool(jnp.all(jnp.isfinite(y)))
    assert bool(jnp.all(jnp.abs(y) <= 1.0))  # tanh output range
    print("KERNEL_OK")
</pallas_src>

<mosaic_0001>
module attributes {stable_mosaic.version = 11 : i64} {
  func.func @_mm_kernel(%arg0: i32, %arg1: i32, %arg2: i32, %arg3: memref<256x384xbf16, #tpu.memory_space<vmem>>, %arg4: memref<384x128xbf16, #tpu.memory_space<vmem>>, %arg5: memref<1x128xf32, #tpu.memory_space<vmem>>, %arg6: memref<1x128xf32, #tpu.memory_space<vmem>>, %arg7: memref<256x128xbf16, #tpu.memory_space<vmem>>, %arg8: memref<256x128xf32, #tpu.memory_space<vmem>>) attributes {dimension_semantics = [#tpu.dimension_semantics<parallel>, #tpu.dimension_semantics<parallel>, #tpu.dimension_semantics<arbitrary>], iteration_bounds = array<i64: 24, 1, 1>, scalar_prefetch = 0 : i64, scratch_operands = 1 : i64, tpu.core_type = #tpu.core_type<tc>, window_params = [{transform_indices = @transform_0, window_bounds = array<i64: 256, 384>}, {transform_indices = @transform_1, window_bounds = array<i64: 384, 128>}, {transform_indices = @transform_2, window_bounds = array<i64: 1, 128>}, {transform_indices = @transform_3, window_bounds = array<i64: 1, 128>}, {transform_indices = @transform_4, window_bounds = array<i64: 256, 128>}]} {
    %c0_i32 = arith.constant 0 : i32
    %0 = arith.cmpi eq, %arg2, %c0_i32 : i32
    %1 = arith.extui %0 : i1 to i32
    %c0_i32_0 = arith.constant 0 : i32
    %2 = arith.cmpi ne, %1, %c0_i32_0 : i32
    scf.if %2 {
      %cst_10 = arith.constant 0.000000e+00 : f32
      %12 = vector.broadcast %cst_10 : f32 to vector<256x128xf32>
      %c0_11 = arith.constant 0 : index
      %c0_12 = arith.constant 0 : index
      %13 = vector.load %arg8[%c0_11, %c0_12] : memref<256x128xf32, #tpu.memory_space<vmem>>, vector<256x128xf32>
      tpu.vector_store %arg8[%c0_11, %c0_12], %12 {strides = array<i32>} : memref<256x128xf32, #tpu.memory_space<vmem>>, vector<256x128xf32>,
    } else {
    }
    %c0 = arith.constant 0 : index
    %c0_1 = arith.constant 0 : index
    %3 = vector.load %arg8[%c0, %c0_1] : memref<256x128xf32, #tpu.memory_space<vmem>>, vector<256x128xf32>
    %c0_2 = arith.constant 0 : index
    %c0_3 = arith.constant 0 : index
    %4 = vector.load %arg3[%c0_2, %c0_3] : memref<256x384xbf16, #tpu.memory_space<vmem>>, vector<256x384xbf16>
    %c0_4 = arith.constant 0 : index
    %c0_5 = arith.constant 0 : index
    %5 = vector.load %arg4[%c0_4, %c0_5] : memref<384x128xbf16, #tpu.memory_space<vmem>>, vector<384x128xbf16>
    %cst = arith.constant dense<0.000000e+00> : vector<256x128xf32>
    %6 = tpu.matmul %4, %5, %cst {dimension_numbers = #tpu.dot_dimension_numbers<[1], [0], [0], [1], [0, 0, 1, 1], [], []>} : vector<256x384xbf16>, vector<384x128xbf16>, vector<256x128xf32> -> vector<256x128xf32>
    %7 = arith.addf %3, %6 : vector<256x128xf32>
    %c0_6 = arith.constant 0 : index
    %c0_7 = arith.constant 0 : index
    %8 = vector.load %arg8[%c0_6, %c0_7] : memref<256x128xf32, #tpu.memory_space<vmem>>, vector<256x128xf32>
    tpu.vector_store %arg8[%c0_6, %c0_7], %7 {strides = array<i32>} : memref<256x128xf32, #tpu.memory_space<vmem>>, vector<256x128xf32>,
    %c0_i32_8 = arith.constant 0 : i32
    %9 = arith.cmpi eq, %arg2, %c0_i32_8 : i32
    %10 = arith.extui %9 : i1 to i32
    %c0_i32_9 = arith.constant 0 : i32
    %11 = arith.cmpi ne, %10, %c0_i32_9 : i32
    scf.if %11 {
      %c0_10 = arith.constant 0 : index
      %c0_11 = arith.constant 0 : index
      %12 = vector.load %arg8[%c0_10, %c0_11] : memref<256x128xf32, #tpu.memory_space<vmem>>, vector<256x128xf32>
      %c0_12 = arith.constant 0 : index
      %c0_13 = arith.constant 0 : index
      %13 = vector.load %arg6[%c0_12, %c0_13] : memref<1x128xf32, #tpu.memory_space<vmem>>, vector<1x128xf32>
      %14 = vector.broadcast %13 : vector<1x128xf32> to vector<256x128xf32>
      %15 = arith.mulf %12, %14 : vector<256x128xf32>
      %c0_14 = arith.constant 0 : index
      %c0_15 = arith.constant 0 : index
      %16 = vector.load %arg5[%c0_14, %c0_15] : memref<1x128xf32, #tpu.memory_space<vmem>>, vector<1x128xf32>
      %17 = vector.broadcast %16 : vector<1x128xf32> to vector<256x128xf32>
      %18 = arith.addf %15, %17 : vector<256x128xf32>
      %cst_16 = arith.constant 0.000000e+00 : f32
      %19 = vector.broadcast %cst_16 : f32 to vector<256x128xf32>
      %20 = arith.maximumf %18, %19 : vector<256x128xf32>
      %21 = arith.truncf %20 : vector<256x128xf32> to vector<256x128xbf16>
      %c0_17 = arith.constant 0 : index
      %c0_18 = arith.constant 0 : index
      %22 = vector.load %arg7[%c0_17, %c0_18] : memref<256x128xbf16, #tpu.memory_space<vmem>>, vector<256x128xbf16>
      tpu.vector_store %arg7[%c0_17, %c0_18], %21 {strides = array<i32>} : memref<256x128xbf16, #tpu.memory_space<vmem>>, vector<256x128xbf16>,
    } else {
    }
    return
  }
  func.func @transform_0(%arg0: i32, %arg1: i32, %arg2: i32) -> (i32, i32) {
    %c0_i32 = arith.constant 0 : i32
    return %arg0, %arg2 : i32, i32
  }
  func.func @transform_1(%arg0: i32, %arg1: i32, %arg2: i32) -> (i32, i32) {
    %c0_i32 = arith.constant 0 : i32
    return %arg2, %arg1 : i32, i32
  }
  func.func @transform_2(%arg0: i32, %arg1: i32, %arg2: i32) -> (i32, i32) {
    %c0_i32 = arith.constant 0 : i32
    %c0_i32_0 = arith.constant 0 : i32
    return %c0_i32, %arg1 : i32, i32
  }
  func.func @transform_3(%arg0: i32, %arg1: i32, %arg2: i32) -> (i32, i32) {
    %c0_i32 = arith.constant 0 : i32
    %c0_i32_0 = arith.constant 0 : i32
    return %c0_i32, %arg1 : i32, i32
  }
  func.func @transform_4(%arg0: i32, %arg1: i32, %arg2: i32) -> (i32, i32) {
    %c0_i32 = arith.constant 0 : i32
    return %arg0, %arg1 : i32, i32
  }
}

</mosaic_0001>

<bundles_post_ra>
// kernel: tpu_custom_call.1
= control target key start
LH: loop header
LB: loop body
LE: loop exit
PB: predicated region body
PF: predicated region fallthrough
CT: control target
= control target key end

     0   :  { %s2970_s0 = inlined_call_operand.hbm [shape: bf16[6144,384], index: 0, kind: input, shape index: {}]   ;;  %s2971_s1 = inlined_call_operand.hbm [shape: bf16[384,128], index: 1, kind: input, shape index: {}]   ;;  %s2972_s2 = inlined_call_operand.hbm [shape: f32[1,128], index: 2, kind: input, shape index: {}]   ;;  %s2973_s3 = inlined_call_operand.hbm [shape: f32[1,128], index: 3, kind: input, shape index: {}]   ;;  %s2974_s4 = inlined_call_operand.hbm [shape: bf16[6144,128], index: 4, kind: output, shape index: {}]  }
   0x1   :  { %2978 = sst [smem:[#allocation16_spill]] %s2971_s1 }
   0x2   :  { %2979 = sst [smem:[#allocation17_spill]] %s2972_s2 }
   0x3   :  { %9 = vsyncpa [#allocation4], 0 }
   0x4   :  { %11 = vsyncpa [#allocation4 + $0x1], 0 }
   0x5   :  { %12 = vsyncpa [#allocation7], 0 }
   0x6   :  { %13 = vsyncpa [#allocation10], 0 }
   0x7   :  { %14 = vsyncpa [#allocation5], 0 }
   0x8   :  { %16 = vsyncpa [#allocation5 + $0x1], 0  ;;  %s2600_s15 = smov 0   ;;  %s2602_s16 = smov 0  }
   0x9   :  { %s2604_s17 = smov 0   ;;  %s2606_s18 = smov 0  }
   0xa   :  { %s2608_s19 = smov 0   ;;  %s2610_s20 = smov 0  }
   0xb LB: > { %s1724_s21 = sadd.s32 4294967295, %s2562_s20   ;;  %s1725_s22 = sadd.s32 4294967294, %s2562_s20   ;;  %s2562_s20 = sphi %s2610_s20, %s22_s20   ;;  %s2558_s19 = sphi %s2608_s19, %s2997_s19   ;;  %s2554_s18 = sphi %s2606_s18, %s2996_s18   ;;  %s2550_s17 = sphi %s2604_s17, %s2995_s17   ;;  %s2546_s16 = sphi %s2602_s16, %s2994_s16   ;;  %s2542_s15 = sphi %s2600_s15, %s2993_s15  }
   0xc   : > { %p63_p0 = scmp.ne.s32.totalorder %s2546_s16, %s2542_s15  ;;  %p2634_p1 = scmp.eq.s32.totalorder %s1724_s21, 0 }
   0xd   : > { %p2638_p2 = scmp.eq.s32.totalorder %s1724_s21, 23  ;;  %p175_p3 = scmp.eq.s32.totalorder %s1725_s22, 23 }
   0xe   : > { %s2980_s23 = scalar_select %p2634_p1, 1, 0 }
   0xf   : > { %p2644_p4 = por %p2634_p1, %p63_p0  ;;  %p1726_p5 = scmp.ge.s32.totalorder %s2562_s20, 1 }
  0x10   : > { %p2649_p6 = por %p175_p3, %p63_p0  ;;  %p182_p7 = scmp.lt.s32.totalorder %s2562_s20, 25 }
  0x11   : > { %s2982_s25 = scalar_select %p2644_p4, 1, 0 }
  0x12   : > { %s2983_s26 = scalar_select %p2649_p6, 1, 0 }
  0x13   : > { %p2654_p8 = pnand %p1726_p5, %p182_p7  ;;  %s2564_s28 = smov [#allocation6]  }
  0x14   : > { %s198_s29 = sshll.u32 %s2564_s28, 4  ;;  %s2565_s5 = smov [#allocation8]   ;;  %s199_s29 = int_to_ptr.vmem [resolvable:$true] %s198_s29 }
  0x15   : > { %p2197_p9 = pneg %p2654_p8  ;;  %s214_s6 = sshll.u32 %s2565_s5, 4  ;;  %s215_s6 = int_to_ptr.vmem [resolvable:$true] %s214_s6 }
  0x16   : > { %s2566_s7 = smov [#allocation9]   ;;  %s2379_s9 = scalar_lea.vmem %s199_s29, 3072 }
  0x17   : > { %p2662_p10 = pnand %p2197_p9, %p2634_p1  ;;  %s227_s8 = sshll.u32 %s2566_s7, 4  ;;  %s228_s8 = int_to_ptr.vmem [resolvable:$true] %s227_s8 }
  0x18   : > { %p2380_p12 = scmp.ne.s32.totalorder %s199_s29, %s2379_s9  ;;  %p2387_p3 = scmp.lt.s32.totalorder %s199_s29, %s199_s29 }
  0x19   : > { %p2370_p11 = pneg %p2662_p10  ;;  %p2388_p5 = scmp.lt.s32.totalorder %s2379_s9, %s2379_s9 }
  0x1b   : > { %p2382_p13 = pnand %p2380_p12, %p2370_p11  ;;  %p2389_p7 = por %p2388_p5, %p2387_p3 }
  0x1d   : > { %p2383_p0 = pneg %p2382_p13 }
  0x1f   : > { %p2390_p9 = pnand %p2389_p7, %p2383_p0 }
  0x21   : > { %2393 = shalt.err (!%p2390_p9)
}
  0x22   : > { %s2567_s10 = smov 64   ;;  %s2568_s11 = smov 4  }
  0x23   : > { %s2986_s1 = sld [smem:[#allocation16_spill]]  ;;  %s2405_s14 = scalar_lea.vmem %s215_s6, 16 }
  0x24   : > { %p2406_p6 = scmp.ne.s32.totalorder %s215_s6, %s2405_s14  ;;  %s2412_s21 = scalar_lea.vmem %s215_s6, 32 }
  0x25   : > { %p2413_p1 = scmp.lt.s32.totalorder %s215_s6, %s215_s6  ;;  %p2414_p3 = scmp.lt.s32.totalorder %s2412_s21, %s2405_s14 }
  0x26   : > { %p2408_p12 = pnand %p2406_p6, %p2370_p11 }
  0x27   : > { %p2415_p0 = por %p2414_p3, %p2413_p1 }
  0x28   : > { %p2409_p13 = pneg %p2408_p12 }
  0x29   : > { %2200 = dma.hbm_to_vmem [thread:$0]  (!%p2662_p10), %s2986_s1, 3072, %s199_s29, [#allocation7], %s2567_s10, %s2567_s10, %s2568_s11  }
  0x2a   : > { %p2416_p5 = pnand %p2415_p0, %p2409_p13 }
  0x2c   : > { %2419 = shalt.err (!%p2416_p5)
}
  0x2d   : > { %s2987_s2 = sld [smem:[#allocation17_spill]]  ;;  %s2431_s29 = scalar_lea.vmem %s228_s8, 16 }
  0x2e   : > { %p2432_p7 = scmp.ne.s32.totalorder %s228_s8, %s2431_s29  ;;  %s2438_s5 = scalar_lea.vmem %s228_s8, 32 }
  0x2f   : > { %p2439_p12 = scmp.lt.s32.totalorder %s228_s8, %s228_s8  ;;  %p2440_p4 = scmp.lt.s32.totalorder %s2438_s5, %s2431_s29 }
  0x30   : > { %p2434_p6 = pnand %p2432_p7, %p2370_p11 }
  0x31   : > { %p2441_p1 = por %p2440_p4, %p2439_p12 }
  0x32   : > { %p2435_p9 = pneg %p2434_p6 }
  0x33   : > { %2203 = dma.hbm_to_vmem [thread:$0]  (!%p2662_p10), %s2987_s2, 16, %s215_s6, [#allocation7]  }
  0x34   : > { %p2442_p13 = pnand %p2441_p1, %p2435_p9 }
  0x36   : > { %2445 = shalt.err (!%p2442_p13)
}
  0x37   : > { %2206 = dma.hbm_to_vmem [thread:$0]  (!%p2662_p10), %s2973_s3, 16, %s228_s8, [#allocation10]  }
  0x38   : > { %s50_s6 = sadd.s32 1, %s2550_s17  ;;  %s41_s10 = sadd.s32 1, %s2558_s19 }
  0x39   : > { %p57_p4 = scmp.ne.s32.totalorder %s2550_s17, %s2546_s16  ;;  %p43_p11 = scmp.ge.s32.totalorder %s41_s10, 24 }
  0x3a   : > { %p58_p3 = scmp.eq.s32.totalorder %s2562_s20, 0  ;;  %p2218_p5 = scmp.lt.s32.totalorder %s2562_s20, 24 }
  0x3b   : > { %p2699_p0 = por %p2638_p2, %p57_p4  ;;  %s2999_s10 = smov (%p43_p11, %s41_s10), 0 }
  0x3c   : > { %p59_p7 = por %p58_p3, %p57_p4  ;;  %s238_s11 = sand.u32 1, %s2550_s17  }
  0x3d   : > { %s45_s12 = ssub.s32 %s2558_s19, %s2999_s10  ;;  %s2178_s8 = smul.u32 384, %s238_s11 }
  0x3e   : > { %p48_p6 = scmp.eq.s32.totalorder %s45_s12, 0  ;;  %s2179_s13 = smul.u32 6144, %s2558_s19 }
  0x3f   : > { %p2710_p10 = pnand %p2218_p5, %p59_p7  ;;  %s242_s29 = scalar_lea.vmem [#allocation3], %s2178_s8 }
  0x40   : > { %s2715_s24 = scalar_select %p48_p6, %s2550_s17, %s50_s6  }
  0x41   : > { %s251_s28 = scalar_lea.hbm %s2970_s0, %s2179_s13  ;;  %s252_s5 = sshll.u32 %s242_s29, 4  ;;  %s253_s5 = int_to_ptr.vmem [resolvable:$true] %s252_s5 }
  0x42   : > { %s239_s7 = scalar_lea.sflag [#allocation4], %s238_s11  ;;  %p2448_p2 = pneg %p2710_p10 }
  0x43   : > { %s2459_s9 = scalar_lea.vmem %s253_s5, 6144  ;;  %s2569_s12 = smov [#allocation3]  }
  0x44   : > { %p2460_p9 = scmp.ne.s32.totalorder %s253_s5, %s2459_s9  ;;  %s2464_s1 = sshll.u32 %s2569_s12, 4  ;;  %s2465_s1 = int_to_ptr.vmem [resolvable:$false] %s2464_s1 }
  0x45   : > { %s2466_s2 = scalar_lea.vmem %s2465_s1, 12288  ;;  %p2467_p13 = scmp.lt.s32.totalorder %s253_s5, %s2465_s1 }
  0x46   : > { %p2462_p12 = pnand %p2460_p9, %p2448_p2  ;;  %p2468_p4 = scmp.lt.s32.totalorder %s2466_s2, %s2459_s9 }
  0x48   : > { %p2463_p1 = pneg %p2462_p12  ;;  %p2469_p11 = por %p2468_p4, %p2467_p13 }
  0x4a   : > { %p2470_p3 = pnand %p2469_p11, %p2463_p1 }
  0x4c   : > { %2473 = shalt.err (!%p2470_p3)
}
  0x4d   : > { %s2570_s6 = smov 192   ;;  %s2571_s8 = smov 12  }
  0x4e   : > { %2210 = dma.hbm_to_vmem [thread:$0]  (!%p2710_p10), %s251_s28, 6144, %s253_s5, %s239_s7, %s2570_s6, %s2570_s6, %s2571_s8  }
  0x4f   : > { %264 = sbr.rel (%p2654_p8) target bundleno = 436 (0x1b4), region = 36  ;;  %s2727_s11 = sand.u32 (!%p2654_p8), 1, %s2546_s16  }
  0x50   : > { %s2180_s13 = smul.u32 (!%p2654_p8), 384, %s2727_s11  ;;  %s267_s1 = scalar_lea.sflag (!%p2654_p8), [#allocation4], %s2727_s11 }
  0x51   : > { %p2990_p5 = scmp.ne.s32.totalorder (!%p2654_p8), %s2982_s25, 0 }
  0x52   : > { %s2731_s2 = scalar_lea.vmem (!%p2654_p8), [#allocation3], %s2180_s13 }
  0x54   : > { %2525 = dma.done.wait (%p2990_p5), %s267_s1, 6144  }
  0x55   : > { %2527 = vsyncadd (%p2990_p5), %s267_s1, 4294961152  ;;  %p2991_p7 = scmp.ne.s32.totalorder %s2980_s23, 0 }
  0x57   : > { %2529 = dma.done.wait (%p2991_p7), [#allocation7], 3088  }
  0x58   : > { %2531 = vsyncadd (%p2991_p7), [#allocation7], 4294964208 }
  0x59   : > { %2533 = dma.done.wait (%p2991_p7), [#allocation10], 16  }
  0x5a   : > { %2535 = vsyncadd (%p2991_p7), [#allocation10], 4294967280  ;;  %v2280_v0 = vld [vmem:[#allocation6 + $0x78] sm:$0xff]   ;;  %v2282_v2 = vld [vmem:[#allocation6 + $0x70] sm:$0xff]   ;;  %s1738_s23 = sshll.u32 %s2727_s11, 7  ;;  %s1882_s27 = sshll.u32 %s2554_s18, 11 }
  0x5b   : > { %v2281_v1 = vld [vmem:[#allocation6 + $0x38] sm:$0xff]   ;;  %1978 = vmatprep.subr.bf16.mxu0 %v2280_v0  ;;  %2162 = vmatprep.subr.bf16.mxu1 %v2280_v0  ;;  %v2283_v3 = vld [vmem:[#allocation6 + $0x30] sm:$0xff]   ;;  %v2284_v4 = vld [vmem:[#allocation6 + $0x68] sm:$0xff]   ;;  %s2829_s25 = scalar_lea.vmem [#allocation11], %s1738_s23  ;;  %s2919_s28 = scalar_lea.hbm %s2974_s4, %s1882_s27 }
  0x5c   : > { %1979 = vmatpush3.bf16.msra.mxu0 %v2281_v1  ;;  %2170 = vmatpush3.bf16.msra.mxu1 %v2281_v1  ;;  %v2285_v5 = vld [vmem:[#allocation6 + $0x28] sm:$0xff]   ;;  %v2286_v6 = vld [vmem:[#allocation6 + $0x60] sm:$0xff]   ;;  %v2288_v8 = vld [vmem:[#allocation6 + $0x58] sm:$0xff]   ;;  %s1598_s14 = sshll.u32 %s2829_s25, 4  ;;  %s1584_s18 = scalar_lea.sflag [#allocation5], %s2727_s11  ;;  %s2921_s14 = int_to_ptr.vmem [resolvable:$true] %s1598_s14 }
  0x5d   : > { %1980 = vmatprep.subr.bf16.mxu0 %v2282_v2  ;;  %2163 = vmatprep.subr.bf16.mxu1 %v2282_v2  ;;  %v2287_v7 = vld [vmem:[#allocation6 + $0x20] sm:$0xff]   ;;  %v2289_v9 = vld [vmem:[#allocation6 + $0x18] sm:$0xff]   ;;  %v2290_v10 = vld [vmem:[#allocation6 + $0x50] sm:$0xff]   ;;  %s2474_s29 = scalar_lea.vmem %s2921_s14, 2048  ;;  %s2572_s5 = smov [#allocation11]  }
  0x5e   : > { %v2298_v11 = vld [vmem:[%s2731_s2 + $0x4] ss:$12 sps:$4 sm:$0xff]   ;;  %v2292_v14 = vld [vmem:[#allocation6 + $0x48] sm:$0xff]   ;;  %v2302_v18 = vld [vmem:[#allocation6 + $0xb8] sm:$0xff]   ;;  %p2475_p8 = scmp.ne.s32.totalorder %s2921_s14, %s2474_s29  ;;  %s2478_s7 = sshll.u32 %s2572_s5, 4  ;;  %s2479_s7 = int_to_ptr.vmem [resolvable:$false] %s2478_s7 }
  0x5f   : > { %v2301_v12 = vld [vmem:[%s2731_s2 + $0x124] ss:$12 sps:$4 sm:$0xff]   ;;  %924 = vmatprep.mubr.bf16.mxu0 %v2298_v11  ;;  %v2293_v15 = vld [vmem:[#allocation6 + $0x8] sm:$0xff]   ;;  %v2312_v28 = vld [vmem:[%s2731_s2 + $0x34] ss:$12 sps:$4 sm:$0xff]   ;;  %s2480_s9 = scalar_lea.vmem %s2479_s7, 4096  ;;  %p2481_p2 = scmp.lt.s32.totalorder %s2921_s14, %s2479_s7 }
  0x60   : > { %1981 = vmatpush3.bf16.msra.mxu0 %v2283_v3  ;;  %2171 = vmatpush3.bf16.msra.mxu1 %v2283_v3  ;;  %v2291_v13 = vld [vmem:[#allocation6 + $0x10] sm:$0xff]   ;;  %v2294_v16 = vld [vmem:[#allocation6 + $0x40] sm:$0xff]   ;;  %v2304_v21 = vld [vmem:[%s2731_s2 + $0x1c] ss:$12 sps:$4 sm:$0xff]   ;;  %p2476_p6 = pnand %p2475_p8, %p2699_p0  ;;  %p2482_p9 = scmp.lt.s32.totalorder %s2480_s9, %s2474_s29 }
  0x61   : > { %1982 = vmatprep.subr.bf16.mxu0 %v2284_v4  ;;  %2164 = vmatprep.subr.bf16.mxu1 %v2284_v4  ;;  %v2295_v17 = vld [vmem:[#allocation6] sm:$0xff]   ;;  %v2303_v22 = vld [vmem:[#allocation6 + $0xb0] sm:$0xff]   ;;  %v2306_v23 = vld [vmem:[%s2731_s2 + $0x13c] ss:$12 sps:$4 sm:$0xff]  }
  0x62   : > { %1020 = vmatprep.mubr.bf16.mxu1 %v2301_v12  ;;  %v2296_v19 = vld [vmem:[%s2731_s2] ss:$12 sps:$4 sm:$0xff]   ;;  %v2308_v24 = vld [vmem:[%s2731_s2 + $0x18] ss:$12 sps:$4 sm:$0xff]   ;;  %v2316_v31 = vld [vmem:[%s2731_s2 + $0x30] ss:$12 sps:$4 sm:$0xff]   ;;  %p2477_p10 = pneg %p2476_p6  ;;  %p2483_p12 = por %p2482_p9, %p2481_p2 }
  0x63   : > { %v2299_v20 = vld [vmem:[%s2731_s2 + $0x120] ss:$12 sps:$4 sm:$0xff]   ;;  %v2309_v26 = vld [vmem:[%s2731_s2 + $0x138] ss:$12 sps:$4 sm:$0xff]   ;;  %v2317_v32 = vld [vmem:[%s2731_s2 + $0x150] ss:$12 sps:$4 sm:$0xff]  }
  0x64   : > { %1983 = vmatpush3.bf16.msra.mxu0 %v2285_v5  ;;  %2172 = vmatpush3.bf16.msra.mxu1 %v2285_v5  ;;  %v2310_v25 = vld [vmem:[#allocation6 + $0xa8] sm:$0xff]   ;;  %v2311_v27 = vld [vmem:[#allocation6 + $0xa0] sm:$0xff]   ;;  %v2318_v30 = vld [vmem:[#allocation6 + $0x98] sm:$0xff]   ;;  %p2484_p1 = pnand %p2483_p12, %p2477_p10 }
  0x65   : > { %1984 = vmatprep.subr.bf16.mxu0 %v2286_v6  ;;  %2165 = vmatprep.subr.bf16.mxu1 %v2286_v6  ;;  %v2314_v29 = vld [vmem:[%s2731_s2 + $0x154] ss:$12 sps:$4 sm:$0xff]   ;;  %v2320_v34 = vld [vmem:[%s2731_s2 + $0x4c] ss:$12 sps:$4 sm:$0xff]   ;;  %v2328_v39 = vld [vmem:[%s2731_s2 + $0x64] ss:$12 sps:$4 sm:$0xff]  }
  0x66   : > { %v2319_v33 = vld [vmem:[#allocation6 + $0x90] sm:$0xff]   ;;  %v2322_v35 = vld [vmem:[%s2731_s2 + $0x16c] ss:$12 sps:$4 sm:$0xff]   ;;  %v2327_v40 = vld [vmem:[#allocation6 + $0x80] sm:$0xff]  }
  0x67   : > { %v2326_v36 = vld [vmem:[#allocation6 + $0x88] sm:$0xff]   ;;  %v2335_v45 = vld [vmem:[%s2731_s2 + $0x38] ss:$12 sps:$4 sm:$0xff]   ;;  %v2337_v47 = vld [vmem:[%s2731_s2 + $0x50] ss:$12 sps:$4 sm:$0xff]  }
  0x68   : > { %1985 = vmatpush3.bf16.msra.mxu0 %v2287_v7  ;;  %2173 = vmatpush3.bf16.msra.mxu1 %v2287_v7  ;;  %v2324_v37 = vld [vmem:[%s2731_s2 + $0x48] ss:$12 sps:$4 sm:$0xff]   ;;  %v2331_v42 = vld [vmem:[%s2731_s2 + $0x60] ss:$12 sps:$4 sm:$0xff]   ;;  %v2336_v46 = vld [vmem:[%s2731_s2 + $0x78] ss:$12 sps:$4 sm:$0xff]  }
  0x69   : > { %1986 = vmatprep.subr.bf16.mxu0 %v2288_v8  ;;  %2166 = vmatprep.subr.bf16.mxu1 %v2288_v8  ;;  %v2325_v38 = vld [vmem:[%s2731_s2 + $0x168] ss:$12 sps:$4 sm:$0xff]   ;;  %v2332_v43 = vld [vmem:[%s2731_s2 + $0x20] ss:$12 sps:$4 sm:$0xff]   ;;  %v2341_v50 = vld [vmem:[%s2731_s2 + $0x90] ss:$12 sps:$4 sm:$0xff]  }
  0x6a   : > { %v2330_v41 = vld [vmem:[%s2731_s2 + $0x8] ss:$12 sps:$4 sm:$0xff]   ;;  %v2342_v51 = vld [vmem:[%s2731_s2 + $0x80] ss:$12 sps:$4 sm:$0xff]   ;;  %v2345_v53 = vld [vmem:[%s2731_s2 + $0x98] ss:$12 sps:$4 sm:$0xff]  }
  0x6b   : > { %v2333_v44 = vld [vmem:[%s2731_s2 + $0x7c] ss:$12 sps:$4 sm:$0xff]   ;;  %v2338_v48 = vld [vmem:[%s2731_s2 + $0x94] ss:$12 sps:$4 sm:$0xff]   ;;  %v2343_v52 = vld [vmem:[%s2731_s2 + $0xac] ss:$12 sps:$4 sm:$0xff]  }
  0x6c   : > { %1987 = vmatpush3.bf16.msra.mxu0 %v2289_v9  ;;  %2174 = vmatpush3.bf16.msra.mxu1 %v2289_v9  ;;  %v2340_v49 = vld [vmem:[%s2731_s2 + $0x68] ss:$12 sps:$4 sm:$0xff]   ;;  %v2347_v55 = vld [vmem:[%s2731_s2 + $0xb0] ss:$12 sps:$4 sm:$0xff]   ;;  %v2351_v58 = vld [vmem:[%s2731_s2 + $0xc0] ss:$12 sps:$4 sm:$0xff]  }
  0x6d   : > { %1988 = vmatprep.subr.bf16.mxu0 %v2290_v10  ;;  %2167 = vmatprep.subr.bf16.mxu1 %v2290_v10  ;;  %v2346_v54 = vld [vmem:[%s2731_s2 + $0xa8] ss:$12 sps:$4 sm:$0xff]   ;;  %v2348_v56 = vld [vmem:[%s2731_s2 + $0xc4] ss:$12 sps:$4 sm:$0xff]   ;;  %v2352_v59 = vld [vmem:[%s2731_s2 + $0xe0] ss:$12 sps:$4 sm:$0xff]  }
  0x6e   : > { %v2350_v57 = vld [vmem:[%s2731_s2 + $0xc8] ss:$12 sps:$4 sm:$0xff]   ;;  %v2355_v61 = vld [vmem:[%s2731_s2 + $0xf8] ss:$12 sps:$4 sm:$0xff]   ;;  %v2357_v63 = vld [vmem:[%s2731_s2 + $0x110] ss:$12 sps:$4 sm:$0xff]  }
  0x6f   : > { %v2353_v60 = vld [vmem:[%s2731_s2 + $0xdc] ss:$12 sps:$4 sm:$0xff]   ;;  %v2356_v62 = vld [vmem:[%s2731_s2 + $0xd8] ss:$12 sps:$4 sm:$0xff]   ;;  %v2358_v0 = vld [vmem:[%s2731_s2 + $0xf4] ss:$12 sps:$4 sm:$0xff]  }
  0x70   : > { %1989 = vmatpush3.bf16.msra.mxu0 %v2291_v13  ;;  %2175 = vmatpush3.bf16.msra.mxu1 %v2291_v13  ;;  %v2360_v1 = vld [vmem:[%s2731_s2 + $0x128] ss:$12 sps:$4 sm:$0xff]   ;;  %v2361_v2 = vld [vmem:[%s2731_s2 + $0xf0] ss:$12 sps:$4 sm:$0xff]   ;;  %v2362_v3 = vld [vmem:[%s2731_s2 + $0x140] ss:$12 sps:$4 sm:$0xff]  }
  0x71   : > { %1990 = vmatprep.subr.bf16.mxu0 %v2292_v14  ;;  %2168 = vmatprep.subr.bf16.mxu1 %v2292_v14  ;;  %v2363_v4 = vld [vmem:[%s2731_s2 + $0x10c] ss:$12 sps:$4 sm:$0xff]   ;;  %v2366_v6 = vld [vmem:[%s2731_s2 + $0x108] ss:$12 sps:$4 sm:$0xff]   ;;  %v2367_v7 = vld [vmem:[%s2731_s2 + $0x170] ss:$12 sps:$4 sm:$0xff]  }
  0x72   : > { %v2365_v5 = vld [vmem:[%s2731_s2 + $0x158] ss:$12 sps:$4 sm:$0xff]  }
  0x74   : > { %1991 = vmatpush3.bf16.msra.mxu0 %v2293_v15  ;;  %2176 = vmatpush3.bf16.msra.mxu1 %v2293_v15 }
  0x75   : > { %1992 = vmatprep.subr.bf16.mxu0 %v2294_v16  ;;  %2169 = vmatprep.subr.bf16.mxu1 %v2294_v16 }
  0x78   : > { %1993 = vmatpush3.bf16.msra.mxu0 %v2295_v17  ;;  %2177 = vmatpush3.bf16.msra.mxu1 %v2295_v17 }
  0x79   : > { %2114 = vmatprep.subr.bf16.mxu1 %v2302_v18 }
  0x7b   : > { %925 = vmatmul.mubr.bf16.vlgmr.msra.gmra.mxu0 %v2296_v19  ;;  %1021 = vmatmul.mubr.bf16.vlgmr.msra.gmra.mxu1 %v2299_v20 }
  0x7c   : > { %2115 = vmatpush3.bf16.msra.mxu1 %v2302_v18  ;;  %932 = vmatprep.mubr.bf16.mxu0 %v2304_v21 }
  0x7d   : > { %2116 = vmatprep.subr.bf16.mxu1 %v2303_v22  ;;  %1028 = vmatprep.mubr.bf16.mxu1 %v2306_v23 }
  0x80   : > { %2117 = vmatpush3.bf16.msra.mxu1 %v2303_v22 }
  0x81   : > { %2118 = vmatprep.subr.bf16.mxu1 %v2310_v25 }
  0x83   : > { %933 = vmatmul.mubr.bf16.gmra.mxu0 %v2308_v24  ;;  %1029 = vmatmul.mubr.bf16.gmra.mxu1 %v2309_v26 }
  0x84   : > { %2119 = vmatpush3.bf16.msra.mxu1 %v2310_v25  ;;  %940 = vmatprep.mubr.bf16.mxu0 %v2312_v28 }
  0x85   : > { %2120 = vmatprep.subr.bf16.mxu1 %v2311_v27  ;;  %1036 = vmatprep.mubr.bf16.mxu1 %v2314_v29 }
  0x88   : > { %2121 = vmatpush3.bf16.msra.mxu1 %v2311_v27 }
  0x89   : > { %2122 = vmatprep.subr.bf16.mxu1 %v2318_v30 }
  0x8b   : > { %941 = vmatmul.mubr.bf16.gmra.mxu0 %v2316_v31  ;;  %1037 = vmatmul.mubr.bf16.gmra.mxu1 %v2317_v32 }
  0x8c   : > { %2123 = vmatpush3.bf16.msra.mxu1 %v2318_v30  ;;  %948 = vmatprep.mubr.bf16.mxu0 %v2320_v34 }
  0x8d   : > { %2124 = vmatprep.subr.bf16.mxu1 %v2319_v33  ;;  %1044 = vmatprep.mubr.bf16.mxu1 %v2322_v35 }
  0x90   : > { %2125 = vmatpush3.bf16.msra.mxu1 %v2319_v33 }
  0x91   : > { %2126 = vmatprep.subr.bf16.mxu1 %v2326_v36 }
  0x93   : > { %949 = vmatmul.mubr.bf16.gmra.mxu0 %v2324_v37  ;;  %1045 = vmatmul.mubr.bf16.gmra.mxu1 %v2325_v38 }
  0x94   : > { %2127 = vmatpush3.bf16.msra.mxu1 %v2326_v36  ;;  %956 = vmatprep.mubr.bf16.mxu0 %v2328_v39 }
  0x95   : > { %2128 = vmatprep.subr.bf16.mxu1 %v2327_v40  ;;  %2130 = vmatprep.mubr.bf16.mxu1 %v2330_v41 }
  0x98   : > { %2129 = vmatpush3.bf16.msra.mxu1 %v2327_v40 }
  0x9b   : > { %957 = vmatmul.mubr.bf16.gmra.mxu0 %v2331_v42  ;;  %2131 = vmatmul.mubr.bf16.vlgmr.msra.gmra.mxu1 %v2332_v43 }
  0x9c   : > { %964 = vmatprep.mubr.bf16.mxu0 %v2333_v44  ;;  %2134 = vmatprep.mubr.bf16.mxu1 %v2335_v45 }
  0xa3   : > { %965 = vmatmul.mubr.bf16.gmra.mxu0 %v2336_v46  ;;  %2135 = vmatmul.mubr.bf16.gmra.mxu1 %v2337_v47 }
  0xa4   : > { %972 = vmatprep.mubr.bf16.mxu0 %v2338_v48  ;;  %2138 = vmatprep.mubr.bf16.mxu1 %v2340_v49 }
  0xab   : > { %973 = vmatmul.mubr.bf16.gmra.mxu0 %v2341_v50  ;;  %2139 = vmatmul.mubr.bf16.gmra.mxu1 %v2342_v51  ;;  %v2811_v50 = vld [vmem:[#allocation9] ss:$0 sm:$0xff] }
  0xac   : > { %980 = vmatprep.mubr.bf16.mxu0 %v2343_v52  ;;  %2142 = vmatprep.mubr.bf16.mxu1 %v2345_v53 }
  0xb3   : > { %981 = vmatmul.mubr.bf16.gmra.mxu0 %v2346_v54  ;;  %2143 = vmatmul.mubr.bf16.gmra.mxu1 %v2347_v55 }
  0xb4   : > { %988 = vmatprep.mubr.bf16.mxu0 %v2348_v56  ;;  %2146 = vmatprep.mubr.bf16.mxu1 %v2350_v57 }
  0xbb   : > { %989 = vmatmul.mubr.bf16.gmra.mxu0 %v2351_v58  ;;  %2147 = vmatmul.mubr.bf16.gmra.mxu1 %v2352_v59  ;;  %v2814_v58 = vld [vmem:[#allocation8] ss:$0 sm:$0xff] }
  0xbc   : > { %996 = vmatprep.mubr.bf16.mxu0 %v2353_v60  ;;  %2150 = vmatprep.mubr.bf16.mxu1 %v2355_v61 }
  0xc3   : > { %997 = vmatmul.mubr.bf16.gmra.mxu0 %v2356_v62  ;;  %2151 = vmatmul.mubr.bf16.gmra.mxu1 %v2357_v63 }
  0xc4   : > { %1004 = vmatprep.mubr.bf16.mxu0 %v2358_v0  ;;  %2154 = vmatprep.mubr.bf16.mxu1 %v2360_v1 }
  0xcb   : > { %1005 = vmatmul.mubr.bf16.gmra.mxu0 %v2361_v2  ;;  %2155 = vmatmul.mubr.bf16.gmra.mxu1 %v2362_v3 }
  0xcc   : > { %1012 = vmatprep.mubr.bf16.mxu0 %v2363_v4  ;;  %2158 = vmatprep.mubr.bf16.mxu1 %v2365_v5 }
  0xd3   : > { %1013 = vmatmul.mubr.bf16.gmra.mxu0 %v2366_v6  ;;  %2159 = vmatmul.mubr.bf16.gmra.mxu1 %v2367_v7 }
 0x13b   : > { %v1994_v8 = vpop.f32.mrf.mxu0  ;;  %v2066_v9 = vpop.f32.mrf.mxu1 }
 0x13d   : > { %v1995_v10 = vpop.f32.mrf.mxu0  ;;  %v2067_v11 = vpop.f32.mrf.mxu1 }
 0x13e   : > { %v2793_v12 = vadd.f32 %v2067_v11, %v2066_v9  ;;  %v1996_v51 = vadd.f32 %v1995_v10, %v1994_v8 }
 0x13f   : > { %v1997_v13 = vpop.f32.mrf.mxu0  ;;  %v2069_v14 = vpop.f32.mrf.mxu1 }
 0x141   : > { %v1998_v15 = vpop.f32.mrf.mxu0  ;;  %v2070_v16 = vpop.f32.mrf.mxu1 }
 0x142   : > { %v2795_v17 = vadd.f32 %v2070_v16, %v2069_v14  ;;  %v1999_v62 = vadd.f32 %v1998_v15, %v1997_v13 }
 0x143   : > { %v2000_v18 = vpop.f32.mrf.mxu0  ;;  %v2072_v19 = vpop.f32.mrf.mxu1 }
 0x145   : > { %v2001_v20 = vpop.f32.mrf.mxu0  ;;  %v2073_v21 = vpop.f32.mrf.mxu1 }
 0x146   : > { %v2797_v22 = vadd.f32 %v2073_v21, %v2072_v19  ;;  %v2002_v47 = vadd.f32 %v2001_v20, %v2000_v18 }
 0x147   : > { %v2003_v23 = vpop.f32.mrf.mxu0  ;;  %v2075_v24 = vpop.f32.mrf.mxu1 }
 0x149   : > { %v2004_v25 = vpop.f32.mrf.mxu0  ;;  %v2076_v26 = vpop.f32.mrf.mxu1 }
 0x14a   : > { %v2799_v27 = vadd.f32 %v2076_v26, %v2075_v24  ;;  %v2005_v55 = vadd.f32 %v2004_v25, %v2003_v23 }
 0x14b   : > { %v2006_v28 = vpop.f32.mrf.mxu0  ;;  %v2078_v29 = vpop.f32.mrf.mxu1 }
 0x14d   : > { %v2007_v30 = vpop.f32.mrf.mxu0  ;;  %v2079_v31 = vpop.f32.mrf.mxu1 }
 0x14e   : > { %v2801_v32 = vadd.f32 %v2079_v31, %v2078_v29  ;;  %v2008_v8 = vadd.f32 %v2007_v30, %v2006_v28 }
 0x14f   : > { %v2009_v33 = vpop.f32.mrf.mxu0  ;;  %v2081_v34 = vpop.f32.mrf.mxu1 }
 0x151   : > { %v2010_v35 = vpop.f32.mrf.mxu0  ;;  %v2082_v36 = vpop.f32.mrf.mxu1 }
 0x152   : > { %v2803_v37 = vadd.f32 %v2082_v36, %v2081_v34  ;;  %v2011_v26 = vadd.f32 %v2010_v35, %v2009_v33 }
 0x153   : > { %v2012_v38 = vpop.f32.mrf.mxu0  ;;  %v2084_v39 = vpop.f32.mrf.mxu1 }
 0x155   : > { %v2013_v40 = vpop.f32.mrf.mxu0  ;;  %v2085_v41 = vpop.f32.mrf.mxu1 }
 0x156   : > { %v2805_v42 = vadd.f32 %v2085_v41, %v2084_v39  ;;  %v2014_v2 = vadd.f32 %v2013_v40, %v2012_v38 }
 0x157   : > { %v2015_v43 = vpop.f32.mrf.mxu0  ;;  %v2807_v44 = vpop.f32.mrf.mxu1 }
 0x159   : > { %v2016_v45 = vpop.f32.mrf.mxu0  ;;  %v2809_v46 = vpop.f32.mrf.mxu1 }
 0x15a   : > { %v2017_v11 = vadd.f32 %v2016_v45, %v2015_v43 }
 0x15b   : > { %v2018_v48 = vpop.f32.mrf.mxu0  ;;  %v2132_v49 = vpop.f32.mrf.mxu1 }
 0x15c   : > { %v1096_v52 = vadd.f32 %v2132_v49, %v2002_v47 }
 0x15d   : > { %v2019_v53 = vpop.f32.mrf.mxu0  ;;  %v1087_v54 = vpop.f32.mrf.mxu1 }
 0x15e   : > { %v1322_v56 = vmul.f32 %v2811_v50, %v1096_v52  ;;  %v1088_v57 = vadd.f32 %v1996_v51, %v1087_v54  ;;  %v2020_v47 = vadd.f32 %v2019_v53, %v2018_v48 }
 0x15f   : > { %v2816_v59 = vpop.f32.mrf.mxu0  ;;  %v2133_v60 = vpop.f32.mrf.mxu1 }
 0x160   : > { %v1099_v61 = vadd.f32 %v2133_v60, %v2005_v55  ;;  %v1320_v63 = vmul.f32 %v2811_v50, %v1088_v57  ;;  %v1361_v3 = vadd.f32 %v2814_v58, %v1322_v56 }
 0x161   : > { %v2022_v0 = vpop.f32.mrf.mxu0  ;;  %v1090_v1 = vpop.f32.mrf.mxu1 }
 0x162   : > { %v1323_v4 = vmul.f32 %v2811_v50, %v1099_v61  ;;  %v1091_v5 = vadd.f32 %v1999_v62, %v1090_v1  ;;  %v1359_v13 = vadd.f32 %v2814_v58, %v1320_v63  ;;  %v1393_v18 = vmax.f32 %v1361_v3, 0.0 }
 0x163   : > { %v2024_v6 = vpop.f32.mrf.mxu0  ;;  %v2136_v7 = vpop.f32.mrf.mxu1 }
 0x164   : > { %v1362_v9 = vadd.f32 %v2814_v58, %v1323_v4  ;;  %v1112_v10 = vadd.f32 %v2136_v7, %v2014_v2  ;;  %v1321_v14 = vmul.f32 %v2811_v50, %v1091_v5  ;;  %v1391_v30 = vmax.f32 %v1359_v13, 0.0 }
 0x165   : > { %v2025_v15 = vpop.f32.mrf.mxu0  ;;  %v1103_v16 = vpop.f32.mrf.mxu1  ;;  %v2023_v4 = vadd.f32 %v2022_v0, %v2816_v59 }
 0x166   : > { %v1394_v19 = vmax.f32 %v1362_v9, 0.0  ;;  %v1326_v20 = vmul.f32 %v2811_v50, %v1112_v10  ;;  %v1104_v21 = vadd.f32 %v2008_v8, %v1103_v16  ;;  %v1360_v23 = vadd.f32 %v2814_v58, %v1321_v14 }
 0x167   : > { %v2027_v24 = vpop.f32.mrf.mxu0  ;;  %v2137_v25 = vpop.f32.mrf.mxu1  ;;  %v2026_v40 = vadd.f32 %v2025_v15, %v2024_v6 }
 0x168   : > { %v1891_v28 = vpack.c.bf16 %v1394_v19, %v1393_v18  ;;  %v1115_v29 = vadd.f32 %v2137_v25, %v2017_v11  ;;  %v1392_v31 = vmax.f32 %v1360_v23, 0.0  ;;  %v1365_v34 = vadd.f32 %v2814_v58, %v1326_v20 }
 0x169   : > { %v1324_v36 = vmul.f32 %v2811_v50, %v1104_v21  ;;  %v2028_v38 = vpop.f32.mrf.mxu0  ;;  %v1106_v39 = vpop.f32.mrf.mxu1 }
 0x16a   : > { %1963 = vst [vmem:[%s2829_s25 + $0x8] sm:$0xff] %v1891_v28   ;;  %v1327_v41 = vmul.f32 %v2811_v50, %v1115_v29  ;;  %v1886_v43 = vpack.c.bf16 %v1392_v31, %v1391_v30  ;;  %v1107_v33 = vadd.f32 %v2011_v26, %v1106_v39  ;;  %v1397_v52 = vmax.f32 %v1365_v34, 0.0 }
 0x16b   : > { %v2030_v35 = vpop.f32.mrf.mxu0  ;;  %v2140_v45 = vpop.f32.mrf.mxu1  ;;  %v1363_v54 = vadd.f32 %v2814_v58, %v1324_v36  ;;  %v2029_v61 = vadd.f32 %v2028_v38, %v2027_v24 }
 0x16c   : > { %v1366_v49 = vadd.f32 %v2814_v58, %v1327_v41  ;;  %v1128_v51 = vadd.f32 %v2140_v45, %v2026_v40  ;;  %1887 = vst [vmem:[%s2829_s25] sm:$0xff] %v1886_v43   ;;  %v1325_v55 = vmul.f32 %v2811_v50, %v1107_v33 }
 0x16d   : > { %v2031_v56 = vpop.f32.mrf.mxu0  ;;  %v1119_v57 = vpop.f32.mrf.mxu1  ;;  %v1395_v5 = vmax.f32 %v1363_v54, 0.0 }
 0x16e   : > { %v1398_v60 = vmax.f32 %v1366_v49, 0.0  ;;  %v1330_v62 = vmul.f32 %v2811_v50, %v1128_v51  ;;  %v1120_v63 = vadd.f32 %v2020_v47, %v1119_v57  ;;  %v1364_v1 = vadd.f32 %v2814_v58, %v1325_v55 }
 0x16f   : > { %v2033_v48 = vpop.f32.mrf.mxu0  ;;  %v2141_v53 = vpop.f32.mrf.mxu1  ;;  %v2032_v18 = vadd.f32 %v2031_v56, %v2030_v35 }
 0x170   : > { %v1901_v2 = vpack.c.bf16 %v1398_v60, %v1397_v52  ;;  %v1131_v3 = vadd.f32 %v2141_v53, %v2029_v61  ;;  %v1396_v6 = vmax.f32 %v1364_v1, 0.0  ;;  %v1328_v7 = vmul.f32 %v2811_v50, %v1120_v63 }
 0x171   : > { %v2034_v8 = vpop.f32.mrf.mxu0  ;;  %v1122_v9 = vpop.f32.mrf.mxu1  ;;  %v1369_v10 = vadd.f32 %v2814_v58, %v1330_v62 }
 0x172   : > { %1965 = vst [vmem:[%s2829_s25 + $0x18] sm:$0xff] %v1901_v2   ;;  %v1331_v11 = vmul.f32 %v2811_v50, %v1131_v3  ;;  %v1896_v13 = vpack.c.bf16 %v1396_v6, %v1395_v5  ;;  %v1123_v14 = vadd.f32 %v2023_v4, %v1122_v9  ;;  %v1367_v59 = vadd.f32 %v2814_v58, %v1328_v7 }
 0x173   : > { %v2036_v15 = vpop.f32.mrf.mxu0  ;;  %v2144_v16 = vpop.f32.mrf.mxu1  ;;  %v1401_v23 = vmax.f32 %v1369_v10, 0.0  ;;  %v2035_v34 = vadd.f32 %v2034_v8, %v2033_v48 }
 0x174   : > { %v1370_v19 = vadd.f32 %v2814_v58, %v1331_v11  ;;  %1964 = vst [vmem:[%s2829_s25 + $0x10] sm:$0xff] %v1896_v13   ;;  %v1329_v0 = vmul.f32 %v2811_v50, %v1123_v14  ;;  %v1399_v39 = vmax.f32 %v1367_v59, 0.0 }
 0x175   : > { %v2037_v20 = vpop.f32.mrf.mxu0  ;;  %v1135_v21 = vpop.f32.mrf.mxu1 }
 0x176   : > { %v1402_v24 = vmax.f32 %v1370_v19, 0.0  ;;  %v2038_v25 = vadd.f32 %v2037_v20, %v2036_v15  ;;  %v1136_v26 = vadd.f32 %v2032_v18, %v1135_v21  ;;  %v1368_v28 = vadd.f32 %v2814_v58, %v1329_v0 }
 0x177   : > { %v2039_v29 = vpop.f32.mrf.mxu0  ;;  %v2145_v30 = vpop.f32.mrf.mxu1 }
 0x178   : > { %v1911_v31 = vpack.c.bf16 %v1402_v24, %v1401_v23  ;;  %v1144_v36 = vadd.f32 %v2144_v16, %v2038_v25  ;;  %v1332_v38 = vmul.f32 %v2811_v50, %v1136_v26  ;;  %v1400_v40 = vmax.f32 %v1368_v28, 0.0 }
 0x179   : > { %v2040_v41 = vpop.f32.mrf.mxu0  ;;  %v1138_v43 = vpop.f32.mrf.mxu1 }
 0x17a   : > { %1967 = vst [vmem:[%s2829_s25 + $0x28] sm:$0xff] %v1911_v31   ;;  %v1334_v33 = vmul.f32 %v2811_v50, %v1144_v36  ;;  %v2041_v35 = vadd.f32 %v2040_v41, %v2039_v29  ;;  %v1139_v45 = vadd.f32 %v2035_v34, %v1138_v43  ;;  %v1906_v47 = vpack.c.bf16 %v1400_v40, %v1399_v39 }
 0x17b   : > { %v2042_v49 = vpop.f32.mrf.mxu0  ;;  %v2148_v51 = vpop.f32.mrf.mxu1  ;;  %v1371_v52 = vadd.f32 %v2814_v58, %v1332_v38 }
 0x17c   : > { %v1147_v54 = vadd.f32 %v2145_v30, %v2041_v35  ;;  %v1333_v55 = vmul.f32 %v2811_v50, %v1139_v45  ;;  %1966 = vst [vmem:[%s2829_s25 + $0x20] sm:$0xff] %v1906_v47   ;;  %v1373_v56 = vadd.f32 %v2814_v58, %v1334_v33 }
 0x17d   : > { %v2043_v57 = vpop.f32.mrf.mxu0  ;;  %v1151_v60 = vpop.f32.mrf.mxu1  ;;  %v1403_v53 = vmax.f32 %v1371_v52, 0.0 }
 0x17e   : > { %v1335_v61 = vmul.f32 %v2811_v50, %v1147_v54  ;;  %v1372_v62 = vadd.f32 %v2814_v58, %v1333_v55  ;;  %v2044_v63 = vadd.f32 %v2043_v57, %v2042_v49  ;;  %v1405_v5 = vmax.f32 %v1373_v56, 0.0 }
 0x17f   : > { %v2045_v1 = vpop.f32.mrf.mxu0  ;;  %v2149_v48 = vpop.f32.mrf.mxu1 }
 0x180   : > { %v1374_v2 = vadd.f32 %v2814_v58, %v1335_v61  ;;  %v1404_v3 = vmax.f32 %v1372_v62, 0.0  ;;  %v1152_v4 = vadd.f32 %v2044_v63, %v1151_v60 }
 0x181   : > { %v2046_v6 = vpop.f32.mrf.mxu0  ;;  %v1154_v7 = vpop.f32.mrf.mxu1 }
 0x182   : > { %v1406_v8 = vmax.f32 %v1374_v2, 0.0  ;;  %v1916_v9 = vpack.c.bf16 %v1404_v3, %v1403_v53  ;;  %v1336_v10 = vmul.f32 %v2811_v50, %v1152_v4  ;;  %v2047_v11 = vadd.f32 %v2046_v6, %v2045_v1 }
 0x183   : > { %v2048_v13 = vpop.f32.mrf.mxu0  ;;  %v2860_v14 = vpop.f32.mrf.mxu1 }
 0x184   : > { %v1921_v15 = vpack.c.bf16 %v1406_v8, %v1405_v5  ;;  %1968 = vst [vmem:[%s2829_s25 + $0x30] sm:$0xff] %v1916_v9   ;;  %v1155_v16 = vadd.f32 %v2047_v11, %v1154_v7  ;;  %v1375_v59 = vadd.f32 %v2814_v58, %v1336_v10  ;;  %v2089_v7 = vadd.f32 %v2809_v46, %v2807_v44 }
 0x185   : > { %v2049_v18 = vpop.f32.mrf.mxu0  ;;  %v1167_v19 = vpop.f32.mrf.mxu1 }
 0x186   : > { %1969 = vst [vmem:[%s2829_s25 + $0x38] sm:$0xff] %v1921_v15   ;;  %v1337_v0 = vmul.f32 %v2811_v50, %v1155_v16  ;;  %v2050_v20 = vadd.f32 %v2049_v18, %v2048_v13  ;;  %v1407_v29 = vmax.f32 %v1375_v59, 0.0 }
 0x187   : > { %v2051_v21 = vpop.f32.mrf.mxu0  ;;  %v2866_v23 = vpop.f32.mrf.mxu1 }
 0x188   : > { %v1376_v24 = vadd.f32 %v2814_v58, %v1337_v0  ;;  %v1160_v25 = vadd.f32 %v2148_v51, %v2050_v20 }
 0x189   : > { %v2052_v26 = vpop.f32.mrf.mxu0  ;;  %v1170_v28 = vpop.f32.mrf.mxu1 }
 0x18a   : > { %v1408_v30 = vmax.f32 %v1376_v24, 0.0  ;;  %v1338_v31 = vmul.f32 %v2811_v50, %v1160_v25  ;;  %v2053_v34 = vadd.f32 %v2052_v26, %v2051_v21 }
 0x18b   : > { %v2054_v36 = vpop.f32.mrf.mxu0  ;;  %v2156_v38 = vpop.f32.mrf.mxu1 }
 0x18c   : > { %v1926_v39 = vpack.c.bf16 %v1408_v30, %v1407_v29  ;;  %v1163_v40 = vadd.f32 %v2149_v48, %v2053_v34  ;;  %v1192_v41 = vadd.f32 %v2156_v38, %v2797_v22  ;;  %v1377_v35 = vadd.f32 %v2814_v58, %v1338_v31 }
 0x18d   : > { %v2055_v43 = vpop.f32.mrf.mxu0  ;;  %v1183_v33 = vpop.f32.mrf.mxu1 }
 0x18e   : > { %1970 = vst [vmem:[%s2829_s25 + $0x40] sm:$0xff] %v1926_v39   ;;  %v1339_v45 = vmul.f32 %v2811_v50, %v1163_v40  ;;  %v1346_v47 = vmul.f32 %v2811_v50, %v1192_v41  ;;  %v2056_v49 = vadd.f32 %v2055_v43, %v2054_v36  ;;  %v1184_v51 = vadd.f32 %v2793_v12, %v1183_v33 }
 0x18f   : > { %v2057_v52 = vpop.f32.mrf.mxu0  ;;  %v2157_v54 = vpop.f32.mrf.mxu1  ;;  %v1409_v62 = vmax.f32 %v1377_v35, 0.0 }
 0x190   : > { %v1378_v55 = vadd.f32 %v2814_v58, %v1339_v45  ;;  %v1168_v56 = vadd.f32 %v2056_v49, %v1167_v19  ;;  %v1195_v57 = vadd.f32 %v2157_v54, %v2799_v27  ;;  %v1344_v22 = vmul.f32 %v2811_v50, %v1184_v51 }
 0x191   : > { %v2058_v60 = vpop.f32.mrf.mxu0  ;;  %v1186_v61 = vpop.f32.mrf.mxu1  ;;  %v1385_v1 = vadd.f32 %v2814_v58, %v1346_v47 }
 0x192   : > { %v1410_v63 = vmax.f32 %v1378_v55, 0.0  ;;  %v1347_v48 = vmul.f32 %v2811_v50, %v1195_v57  ;;  %v1340_v12 = vmul.f32 %v2811_v50, %v1168_v56  ;;  %v2059_v53 = vadd.f32 %v2058_v60, %v2057_v52 }
 0x193   : > { %v1187_v2 = vadd.f32 %v2795_v17, %v1186_v61  ;;  %v2060_v3 = vpop.f32.mrf.mxu0  ;;  %v2160_v4 = vpop.f32.mrf.mxu1  ;;  %v1383_v8 = vadd.f32 %v2814_v58, %v1344_v22  ;;  %v1417_v15 = vmax.f32 %v1385_v1, 0.0 }
 0x194   : > { %v1931_v5 = vpack.c.bf16 %v1410_v63, %v1409_v62  ;;  %v1386_v27 = vadd.f32 %v2814_v58, %v1347_v48  ;;  %v1208_v6 = vadd.f32 %v2160_v4, %v2805_v42  ;;  %v1171_v9 = vadd.f32 %v2059_v53, %v1170_v28 }
 0x195   : > { %v1345_v10 = vmul.f32 %v2811_v50, %v1187_v2  ;;  %v2061_v11 = vpop.f32.mrf.mxu0  ;;  %v1199_v13 = vpop.f32.mrf.mxu1  ;;  %v1379_v19 = vadd.f32 %v2814_v58, %v1340_v12  ;;  %v1415_v25 = vmax.f32 %v1383_v8, 0.0 }
 0x196   : > { %1971 = vst [vmem:[%s2829_s25 + $0x48] sm:$0xff] %v1931_v5   ;;  %v1418_v17 = vmax.f32 %v1386_v27, 0.0  ;;  %v1350_v16 = vmul.f32 %v2811_v50, %v1208_v6  ;;  %v2062_v18 = vadd.f32 %v2061_v11, %v2060_v3  ;;  %v1341_v42 = vmul.f32 %v2811_v50, %v1171_v9 }
 0x197   : > { %v1384_v44 = vadd.f32 %v2814_v58, %v1345_v10  ;;  %v1200_v46 = vadd.f32 %v2801_v32, %v1199_v13  ;;  %v2063_v59 = vpop.f32.mrf.mxu0  ;;  %v2161_v0 = vpop.f32.mrf.mxu1 }
 0x198   : > { %v1951_v20 = vpack.c.bf16 %v1418_v17, %v1417_v15  ;;  %v1176_v21 = vadd.f32 %v2860_v14, %v2062_v18  ;;  %v1211_v24 = vadd.f32 %v2161_v0, %v2089_v7  ;;  %v1380_v26 = vadd.f32 %v2814_v58, %v1341_v42 }
 0x199   : > { %v1416_v28 = vmax.f32 %v1384_v44, 0.0  ;;  %v1348_v29 = vmul.f32 %v2811_v50, %v1200_v46  ;;  %v2064_v30 = vpop.f32.mrf.mxu0  ;;  %v1202_v31 = vpop.f32.mrf.mxu1  ;;  %v1389_v34 = vadd.f32 %v2814_v58, %v1350_v16  ;;  %v1411_v14 = vmax.f32 %v1379_v19, 0.0 }
 0x19a   : > { %1975 = vst [vmem:[%s2829_s25 + $0x68] sm:$0xff] %v1951_v20   ;;  %v1342_v32 = vmul.f32 %v2811_v50, %v1176_v21  ;;  %v1351_v36 = vmul.f32 %v2811_v50, %v1211_v24  ;;  %v2065_v38 = vadd.f32 %v2064_v30, %v2063_v59  ;;  %v1412_v39 = vmax.f32 %v1380_v26, 0.0 }
 0x19b   : > { %v1946_v40 = vpack.c.bf16 %v1416_v28, %v1415_v25  ;;  %v1203_v41 = vadd.f32 %v2803_v37, %v1202_v31  ;;  %v1387_v45 = vadd.f32 %v2814_v58, %v1348_v29  ;;  %v1421_v49 = vmax.f32 %v1389_v34, 0.0 }
 0x19c   : > { %v1390_v43 = vadd.f32 %v2814_v58, %v1351_v36  ;;  %v1179_v33 = vadd.f32 %v2866_v23, %v2065_v38  ;;  %v1936_v35 = vpack.c.bf16 %v1412_v39, %v1411_v14  ;;  %v1381_v51 = vadd.f32 %v2814_v58, %v1342_v32 }
 0x19d   : > { %1974 = vst [vmem:[%s2829_s25 + $0x60] sm:$0xff] %v1946_v40   ;;  %v1349_v47 = vmul.f32 %v2811_v50, %v1203_v41  ;;  %v1419_v56 = vmax.f32 %v1387_v45, 0.0 }
 0x19e   : > { %v1422_v52 = vmax.f32 %v1390_v43, 0.0  ;;  %v1343_v54 = vmul.f32 %v2811_v50, %v1179_v33  ;;  %1972 = vst [vmem:[%s2829_s25 + $0x50] sm:$0xff] %v1936_v35   ;;  %v1413_v22 = vmax.f32 %v1381_v51, 0.0 }
 0x19f   : > { %v1388_v37 = vadd.f32 %v2814_v58, %v1349_v47 }
 0x1a0   : > { %v1961_v23 = vpack.c.bf16 %v1422_v52, %v1421_v49  ;;  %v1382_v55 = vadd.f32 %v2814_v58, %v1343_v54 }
 0x1a1   : > { %v1420_v57 = vmax.f32 %v1388_v37, 0.0 }
 0x1a2   : > { %1977 = vst [vmem:[%s2829_s25 + $0x78] sm:$0xff] %v1961_v23   ;;  %v1414_v60 = vmax.f32 %v1382_v55, 0.0 }
 0x1a3   : > { %v1956_v61 = vpack.c.bf16 %v1420_v57, %v1419_v56 }
 0x1a4   : > { %v1941_v50 = vpack.c.bf16 %v1414_v60, %v1413_v22 }
 0x1a5   : > { %1976 = vst [vmem:[%s2829_s25 + $0x70] sm:$0xff] %v1956_v61  }
 0x1a6   : > { %1973 = vst [vmem:[%s2829_s25 + $0x58] sm:$0xff] %v1941_v50  }
 0x1a7   : > { %2487 = shalt.err (!%p2484_p1)
}
 0x1a8   : > { %s2488_s12 = scalar_lea.hbm %s2919_s28, 2048  ;;  %s2492_s13 = scalar_lea.hbm %s2974_s4, 49152 }
 0x1a9   : > { %p2489_p13 = scmp.ne.s32.totalorder %s2919_s28, %s2488_s12  ;;  %p2493_p3 = scmp.lt.s32.totalorder %s2919_s28, %s2974_s4 }
 0x1aa   : > { %p2494_p5 = scmp.lt.s32.totalorder %s2492_s13, %s2488_s12 }
 0x1ab   : > { %p2490_p4 = pnand %p2489_p13, %p2699_p0 }
 0x1ac   : > { %p2495_p7 = por %p2494_p5, %p2493_p3 }
 0x1ad   : > { %p2491_p11 = pneg %p2490_p4 }
 0x1af   : > { %p2496_p8 = pnand %p2495_p7, %p2491_p11 }
 0x1b1   : > { %2499 = shalt.err (!%p2496_p8)
}
 0x1b2   : > { %s2573_s23 = smov 64   ;;  %s2574_s25 = smov 4  }
 0x1b3   : > { %2195 = dma.vmem_to_hbm [thread:$0]  (%p2699_p0), %s2921_s14, 2048, %s2919_s28, %s1584_s18, %s2573_s23, %s2573_s23, %s2574_s25  }
 0x1b4 PF: > { %p2222_p6 = scmp.ge.s32.totalorder %s2562_s20, 2  ;;  %s1613_s27 = sand.u32 1, %s2542_s15  }
 0x1b5   : > { %p2992_p10 = scmp.ne.s32.totalorder %s2983_s26, 0  ;;  %s1614_s21 = scalar_lea.sflag [#allocation5], %s1613_s27 }
 0x1b7   : > { %p2212_p2 = pnand %p2222_p6, %p2992_p10 }
 0x1b9   : > { %p2213_p9 = pneg %p2212_p2 }
 0x1bb   : > { %2537 = dma.done.wait (%p2213_p9), %s1614_s21, 2048  }
 0x1bc   : > { %2539 = vsyncadd (%p2213_p9), %s1614_s21, 4294965248  ;;  %s22_s20 = sadd.s32 1, %s2562_s20   ;;  %s2993_s15 = smov %s2546_s16 }
 0x1bd   : > { %p19_p12 = scmp.ge.s32.totalorder %s22_s20, 26   ;;  %s2994_s16 = smov %s2550_s17 }
 0x1be   : > { %s2995_s17 = smov %s2715_s24  ;;  %s2996_s18 = smov %s2558_s19 }
 0x1bf   : > { %s2997_s19 = smov %s2999_s10  ;;  %21 = sbr.rel (!%p19_p12) target bundleno = 11 (0xb), region = 104 }
 0x1c4   :  { %1619 = vsyncpa [#allocation4], 1 }
 0x1c5   :  { %1621 = vsyncpa [#allocation4 + $0x1], 1 }
 0x1c6   :  { %1622 = vsyncpa [#allocation7], 1 }
 0x1c7   :  { %1623 = vsyncpa [#allocation10], 1 }
 0x1c8   :  { %1624 = vsyncpa [#allocation5], 1 }
 0x1c9   :  { %1626 = vsyncpa [#allocation5 + $0x1], 1 }

</bundles_post_ra>
